<compile_context>
chip_gen: v7x
topology: tpu7x:2x2x1
jax: 0.10.0
libtpu: 0.0.40
codegen_flags: <defaults>
</compile_context>

<pallas_src>
import math

import numpy as np
import jax
import jax.numpy as jnp
from jax.experimental import pallas as pl
from jax.experimental.pallas import tpu as pltpu


def _lcm(a, b):
    return a * b // math.gcd(a, b)


def _round_up(x, m):
    return ((x + m - 1) // m) * m


def _make_fused_kernel(n_frontends):
    """One wide matmul per frontend -> accumulate -> +bias -> one dense store."""
    nF = n_frontends

    def kernel(*refs):
        # refs = (x_0..x_{nF-1}, w_0..w_{nF-1}, bias, out)
        o_ref = refs[-1]
        b_ref = refs[2 * nF]
        # First frontend initializes the accumulator, the rest add into it; each
        # frontend's packed weight writes zeros into the other frontends' lane
        # stripes, so the sum reproduces the feature-dim concat exactly.
        acc = jnp.dot(refs[0][...].astype(jnp.bfloat16), refs[nF][...],
                      preferred_element_type=jnp.float32)
        for i in range(1, nF):
            acc = acc + jnp.dot(refs[i][...].astype(jnp.bfloat16),
                                refs[nF + i][...],
                                preferred_element_type=jnp.float32)
        o_ref[...] = (acc + b_ref[...]).astype(o_ref.dtype)

    return kernel


class FusedFrontendsPallas:
    """JAX/Pallas port of FusedFrontends (align_method='linear_projection')."""

    def __init__(self, frontend_output_sizes, hop_lengths, proj_dim=16,
                 key=None, tile_rows=4096, vmem_budget_bytes=24 * 1024 * 1024,
                 out_dtype=jnp.float32):
        assert len(frontend_output_sizes) == len(hop_lengths)
        self.proj_dim = proj_dim
        self.n_frontends = len(frontend_output_sizes)
        self.frontend_output_sizes = [int(s) for s in frontend_output_sizes]
        self.gcd = int(np.gcd.reduce(np.asarray(hop_lengths)))
        self.factors = [int(h) // self.gcd for h in hop_lengths]
        self.tile_rows = int(tile_rows)
        self.vmem_budget_bytes = int(vmem_budget_bytes)
        self.out_dtype = out_dtype

        # Packing group G: every hop factor divides G (a packed row holds whole
        # input frames for every frontend) and G*nF*D is a multiple of 128 so
        # the output tile is lane-dense and stored full-width.
        nFD = self.n_frontends * proj_dim
        G = 128 // math.gcd(128, nFD)
        for f in self.factors:
            G = _lcm(G, f)
        self.G = G

        # ---- torch.nn.Linear-style parameters (f32 master copies) ----
        if key is None:
            key = jax.random.PRNGKey(0)
        self.weights = []   # torch layout: (out_features, in_features)
        self.biases = []
        for i, in_dim in enumerate(self.frontend_output_sizes):
            out_dim = self.factors[i] * proj_dim
            key, kw, kb = jax.random.split(key, 3)
            bound = 1.0 / float(np.sqrt(in_dim))
            w = jax.random.uniform(kw, (out_dim, in_dim), jnp.float32, -bound, bound)
            b = jax.random.uniform(kb, (out_dim,), jnp.float32, -bound, bound)
            self.weights.append(w)
            self.biases.append(b)

        # ---- host-precomputed block-sparse packed weights / packed bias ----
        # For output time step g (within a packed group of G), frontend i uses
        # input frame j = g//f_i of the group and projection column block
        # c = g % f_i, landing at lanes [g*nFD + i*D, g*nFD + (i+1)*D).
        D = proj_dim
        self.packed_weights = []
        bias_pack = np.zeros((1, G * nFD), np.float32)
        for i in range(self.n_frontends):
            f = self.factors[i]
            F = self.frontend_output_sizes[i]
            wt = np.asarray(self.weights[i]).T            # (F, f*D)
            bi = np.asarray(self.biases[i])               # (f*D,)
            Wp = np.zeros(((G // f) * F, G * nFD), np.float32)
            for g in range(G):
                j, c = g // f, g % f
                col = g * nFD + i * D
                Wp[j * F:(j + 1) * F, col:col + D] = wt[:, c * D:(c + 1) * D]
                bias_pack[0, col:col + D] = bi[c * D:(c + 1) * D]
            self.packed_weights.append(jnp.asarray(Wp, jnp.bfloat16))
        self.packed_bias = jnp.asarray(bias_pack, jnp.float32)

    def output_size(self) -> int:
        return self.n_frontends * self.proj_dim

    def __call__(self, frontend_feats, frontend_feats_lens):
        nF, D, G = self.n_frontends, self.proj_dim, self.G
        nFD = nF * D
        B = int(frontend_feats[0].shape[0])
        out_itemsize = jnp.dtype(self.out_dtype).itemsize

        # Common (truncated) output length, exactly as in the torch module.
        m = min(int(frontend_feats[i].shape[1]) * self.factors[i]
                for i in range(nF))
        m_pad = _round_up(m, G)          # pad only to a multiple of G (few frames)
        R = (B * m_pad) // G             # packed rows (G time steps per row)

        # ---- per-frontend inputs: trim/pad frames only when strictly needed ----
        xs, in_specs = [], []
        flops = 0
        bytes_accessed = R * G * nFD * out_itemsize
        per_row_bytes = 2 * G * nFD * out_itemsize      # out block, double-buffered
        resident_bytes = G * nFD * 4                    # packed bias
        for i in range(nF):
            f = self.factors[i]
            F_i = self.frontend_output_sizes[i]
            T_need = m_pad // f
            x = frontend_feats[i]
            T_i = int(x.shape[1])
            # TODO(synk): fold this trim/pad into the kernel (per-batch row offsets
            # + tail masking) to save one HBM pass when T_i != T_need.
            if T_i > T_need:
                x = x[:, :T_need, :]
            elif T_i < T_need:
                x = jnp.pad(x, ((0, 0), (0, T_need - T_i), (0, 0)))
            width = (G // f) * F_i
            xs.append(x.reshape(R, width))              # free row-major view, f32
            in_specs.append(pl.BlockSpec((None, width), lambda t: (t, 0))
                            if False else None)         # placeholder, set below
            flops += 2 * R * width * (G * nFD)
            bytes_accessed += R * width * 4 + width * (G * nFD) * 2
            per_row_bytes += 2 * width * 4              # x block, double-buffered
            resident_bytes += width * (G * nFD) * 2     # bf16 packed weight

        # ---- row tiling (VMEM-budgeted; >=2 tiles when possible for v7x TCs) ----
        avail = self.vmem_budget_bytes - 2 * resident_bytes - (1 << 20)
        if avail < 8 * per_row_bytes:
            # TODO(synk): tile the contraction dim (K-grid) for very large packed
            # weights (huge G * SSL-sized F_i) instead of keeping them resident.
            raise ValueError("packed weights too large for the VMEM budget")
        tp_vmem = max(8, (avail // per_row_bytes) // 8 * 8)
        tp_target = max(8, (self.tile_rows // G // 8) * 8)
        if R <= 8:
            TP = R                                       # single full-extent block
        else:
            half = _round_up(pl.cdiv(R, 2), 8)           # force >= 2 grid steps
            TP = max(8, min(tp_target, tp_vmem, half))
        n_tiles = pl.cdiv(R, TP)                         # partial last block is OK

        # ---- specs ----
        in_specs = []
        for i in range(nF):
            w_i = xs[i].shape[1]
            in_specs.append(pl.BlockSpec((TP, w_i), lambda t: (t, 0)))
        for i in range(nF):
            in_specs.append(pl.BlockSpec(self.packed_weights[i].shape,
                                         lambda t: (0, 0)))          # resident
        in_specs.append(pl.BlockSpec((1, G * nFD), lambda t: (0, 0)))  # resident

        out_spec = pl.BlockSpec((TP, G * nFD), lambda t: (t, 0))
        out_shape = jax.ShapeDtypeStruct((R, G * nFD), self.out_dtype)

        kernel = _make_fused_kernel(nF)
        packed = pl.pallas_call(
            kernel,
            out_shape=out_shape,
            grid=(n_tiles,),
            in_specs=in_specs,
            out_specs=out_spec,
            compiler_params=pltpu.CompilerParams(
                dimension_semantics=("parallel",),
                vmem_limit_bytes=40 * 1024 * 1024),
            cost_estimate=pl.CostEstimate(
                flops=int(flops), transcendentals=0,
                bytes_accessed=int(bytes_accessed)),
        )(*xs, *self.packed_weights, self.packed_bias)

        # Free row-major view back to [B, m_pad, nF*D]; truncate only if padded.
        input_feats = packed.reshape(B, m_pad, nFD)
        if m_pad != m:
            input_feats = input_feats[:, :m, :]
        feats_lens = jnp.ones_like(frontend_feats_lens[0]) * m
        return input_feats, feats_lens


if __name__ == "__main__":
    key = jax.random.PRNGKey(0)
    B = 2
    hop_lengths = [128, 256]          # gcd = 128 -> factors = [1, 2]
    frontend_dims = [80, 32]          # mel-like (80) + small SSL-like (32) frontend
    proj_dim = 16
    n_frames = [256, 128]             # the 2x-hop frontend yields half the frames

    k1, k2, kp = jax.random.split(key, 3)
    feats0 = jax.random.normal(k1, (B, n_frames[0], frontend_dims[0]), jnp.float32)
    feats1 = jax.random.normal(k2, (B, n_frames[1], frontend_dims[1]), jnp.float32)
    lens0 = jnp.full((B,), n_frames[0], dtype=jnp.int32)
    lens1 = jnp.full((B,), n_frames[1], dtype=jnp.int32)

    # tile_rows=128 -> TP=32 packed rows/tile -> 4 pipelined grid steps at demo size.
    model = FusedFrontendsPallas(frontend_dims, hop_lengths, proj_dim=proj_dim,
                                 key=kp, tile_rows=128)
    out, out_lens = model([feats0, feats1], [lens0, lens1])
    out = jax.block_until_ready(out)
    out_lens = jax.block_until_ready(out_lens)

    # Pure-JAX reference of the same forward (same bf16 rounding, f32 accumulate).
    refs = []
    for i, feats in enumerate([feats0, feats1]):
        xb = feats.astype(jnp.bfloat16)
        wb = model.weights[i].astype(jnp.bfloat16)
        p = jnp.einsum('btf,of->bto', xb, wb,
                       preferred_element_type=jnp.float32) + model.biases[i]
        bs, nf, _ = feats.shape
        p = p.reshape(bs, nf * model.factors[i], model.proj_dim)
        refs.append(p)
    m = min(int(x.shape[1]) for x in refs)
    ref_out = jnp.concatenate([x[:, :m, :] for x in refs], axis=-1)
    ref_lens = jnp.ones_like(lens0) * m

    assert out.shape == (B, m, model.output_size()), out.shape
    np.testing.assert_allclose(np.asarray(out), np.asarray(ref_out),
                               rtol=5e-3, atol=5e-3)
    np.testing.assert_array_equal(np.asarray(out_lens), np.asarray(ref_lens))

    print("KERNEL_OK")
</pallas_src>

<mosaic_0001>
module attributes {stable_mosaic.version = 11 : i64} {
  func.func @kernel(%arg0: i32, %arg1: memref<32x320xf32, #tpu.memory_space<vmem>>, %arg2: memref<32x64xf32, #tpu.memory_space<vmem>>, %arg3: memref<320x128xbf16, #tpu.memory_space<vmem>>, %arg4: memref<64x128xbf16, #tpu.memory_space<vmem>>, %arg5: memref<1x128xf32, #tpu.memory_space<vmem>>, %arg6: memref<32x128xf32, #tpu.memory_space<vmem>>) attributes {dimension_semantics = [#tpu.dimension_semantics<parallel>], iteration_bounds = array<i64: 4>, scalar_prefetch = 0 : i64, scratch_operands = 0 : i64, tpu.core_type = #tpu.core_type<tc>, window_params = [{transform_indices = @transform_0, window_bounds = array<i64: 32, 320>}, {transform_indices = @transform_1, window_bounds = array<i64: 32, 64>}, {pipeline_mode = #tpu.pipeline_mode<synchronous>, transform_indices = @transform_2, window_bounds = array<i64: 320, 128>}, {pipeline_mode = #tpu.pipeline_mode<synchronous>, transform_indices = @transform_3, window_bounds = array<i64: 64, 128>}, {pipeline_mode = #tpu.pipeline_mode<synchronous>, transform_indices = @transform_4, window_bounds = array<i64: 1, 128>}, {transform_indices = @transform_5, window_bounds = array<i64: 32, 128>}]} {
    %c0 = arith.constant 0 : index
    %c0_0 = arith.constant 0 : index
    %0 = vector.load %arg1[%c0, %c0_0] : memref<32x320xf32, #tpu.memory_space<vmem>>, vector<32x320xf32>
    %1 = arith.truncf %0 : vector<32x320xf32> to vector<32x320xbf16>
    %c0_1 = arith.constant 0 : index
    %c0_2 = arith.constant 0 : index
    %2 = vector.load %arg3[%c0_1, %c0_2] : memref<320x128xbf16, #tpu.memory_space<vmem>>, vector<320x128xbf16>
    %cst = arith.constant dense<0.000000e+00> : vector<32x128xf32>
    %3 = tpu.matmul %1, %2, %cst {dimension_numbers = #tpu.dot_dimension_numbers<[1], [0], [0], [1], [0, 0, 1, 1], [], []>} : vector<32x320xbf16>, vector<320x128xbf16>, vector<32x128xf32> -> vector<32x128xf32>
    %c0_3 = arith.constant 0 : index
    %c0_4 = arith.constant 0 : index
    %4 = vector.load %arg2[%c0_3, %c0_4] : memref<32x64xf32, #tpu.memory_space<vmem>>, vector<32x64xf32>
    %5 = arith.truncf %4 : vector<32x64xf32> to vector<32x64xbf16>
    %c0_5 = arith.constant 0 : index
    %c0_6 = arith.constant 0 : index
    %6 = vector.load %arg4[%c0_5, %c0_6] : memref<64x128xbf16, #tpu.memory_space<vmem>>, vector<64x128xbf16>
    %cst_7 = arith.constant dense<0.000000e+00> : vector<32x128xf32>
    %7 = tpu.matmul %5, %6, %cst_7 {dimension_numbers = #tpu.dot_dimension_numbers<[1], [0], [0], [1], [0, 0, 1, 1], [], []>} : vector<32x64xbf16>, vector<64x128xbf16>, vector<32x128xf32> -> vector<32x128xf32>
    %8 = arith.addf %3, %7 : vector<32x128xf32>
    %c0_8 = arith.constant 0 : index
    %c0_9 = arith.constant 0 : index
    %9 = vector.load %arg5[%c0_8, %c0_9] : memref<1x128xf32, #tpu.memory_space<vmem>>, vector<1x128xf32>
    %10 = vector.broadcast %9 : vector<1x128xf32> to vector<32x128xf32>
    %11 = arith.addf %8, %10 : vector<32x128xf32>
    %c0_10 = arith.constant 0 : index
    %c0_11 = arith.constant 0 : index
    %12 = vector.load %arg6[%c0_10, %c0_11] : memref<32x128xf32, #tpu.memory_space<vmem>>, vector<32x128xf32>
    tpu.vector_store %arg6[%c0_10, %c0_11], %11 {strides = array<i32>} : memref<32x128xf32, #tpu.memory_space<vmem>>, vector<32x128xf32>,
    return
  }
  func.func @transform_0(%arg0: i32) -> (i32, i32) {
    %c0_i32 = arith.constant 0 : i32
    %c0_i32_0 = arith.constant 0 : i32
    return %arg0, %c0_i32 : i32, i32
  }
  func.func @transform_1(%arg0: i32) -> (i32, i32) {
    %c0_i32 = arith.constant 0 : i32
    %c0_i32_0 = arith.constant 0 : i32
    return %arg0, %c0_i32 : i32, i32
  }
  func.func @transform_2(%arg0: i32) -> (i32, i32) {
    %c0_i32 = arith.constant 0 : i32
    %c0_i32_0 = arith.constant 0 : i32
    %c0_i32_1 = arith.constant 0 : i32
    return %c0_i32, %c0_i32_0 : i32, i32
  }
  func.func @transform_3(%arg0: i32) -> (i32, i32) {
    %c0_i32 = arith.constant 0 : i32
    %c0_i32_0 = arith.constant 0 : i32
    %c0_i32_1 = arith.constant 0 : i32
    return %c0_i32, %c0_i32_0 : i32, i32
  }
  func.func @transform_4(%arg0: i32) -> (i32, i32) {
    %c0_i32 = arith.constant 0 : i32
    %c0_i32_0 = arith.constant 0 : i32
    %c0_i32_1 = arith.constant 0 : i32
    return %c0_i32, %c0_i32_0 : i32, i32
  }
  func.func @transform_5(%arg0: i32) -> (i32, i32) {
    %c0_i32 = arith.constant 0 : i32
    %c0_i32_0 = arith.constant 0 : i32
    return %arg0, %c0_i32 : i32, i32
  }
}

</mosaic_0001>

<bundles_post_ra>
// kernel: tpu_custom_call.1
= control target key start
LH: loop header
LB: loop body
LE: loop exit
PB: predicated region body
PF: predicated region fallthrough
CT: control target
= control target key end

     0   :  { %10 = vsyncpa [#allocation3], 0  ;;  %s1216_s0 = inlined_call_operand.vmem [shape: f32[128,320], index: 0, kind: input, shape index: {}]   ;;  %s1217_s1 = inlined_call_operand.vmem [shape: f32[128,64], index: 1, kind: input, shape index: {}]   ;;  %s1218_s2 = inlined_call_operand.vmem [shape: bf16[320,128], index: 2, kind: input, shape index: {}]   ;;  %s1219_s3 = inlined_call_operand.vmem [shape: bf16[64,128], index: 3, kind: input, shape index: {}]   ;;  %s1220_s4 = inlined_call_operand.vmem [shape: f32[1,128], index: 4, kind: input, shape index: {}]   ;;  %s1221_s5 = inlined_call_operand.hbm [shape: f32[128,128], index: 5, kind: output, shape index: {}]  }
   0x1   :  { %12 = vsyncpa [#allocation3 + $0x1], 0  ;;  %s1010_s18 = smov 0   ;;  %s1012_s19 = smov 0  }
   0x2   :  { %s1014_s20 = smov 0   ;;  %s1016_s21 = smov 0  }
   0x3 LB: > { %s1031_s22 = sadd.s32 4294967295, %s975_s21   ;;  %s731_s23 = sadd.s32 4294967294, %s975_s21   ;;  %s975_s21 = sphi %s1016_s21, %s1227_s21   ;;  %s971_s20 = sphi %s1014_s20, %s1226_s20   ;;  %s967_s19 = sphi %s1012_s19, %s1225_s19   ;;  %s963_s18 = sphi %s1010_s18, %s1224_s18  }
   0x4   : > { %s1035_s24 = sadd.s32 1, %s975_s21   ;;  %s140_s25 = sadd.s32 1, %s971_s20 }
   0x5   : > { %s137_s26 = ssub.s32 %s975_s21, %s1035_s24  ;;  %p150_p0 = scmp.ne.s32.totalorder %s971_s20, %s967_s19 }
   0x6   : > { %p138_p1 = scmp.eq.s32.totalorder %s137_s26, 0  ;;  %p151_p2 = scmp.eq.s32.totalorder %s1031_s22, 3 }
   0x7   : > { %p156_p3 = scmp.ne.s32.totalorder %s967_s19, %s963_s18  ;;  %p157_p4 = scmp.eq.s32.totalorder %s731_s23, 3 }
   0x8   : > { %s1046_s27 = scalar_select %p138_p1, %s971_s20, %s140_s25  }
   0x9   : > { %p1048_p5 = por %p151_p2, %p150_p0  ;;  %p1052_p6 = por %p157_p4, %p156_p3 }
   0xa   : > { %p734_p7 = scmp.ge.s32.totalorder %s975_s21, 1  ;;  %p203_p8 = scmp.lt.s32.totalorder %s975_s21, 5 }
   0xc   : > { %p204_p9 = pnand %p734_p7, %p203_p8 }
   0xd   : > { %v889_v0 = vld [vmem:[%s1219_s3] sm:$0xff] (!%p204_p9)   ;;  %s736_s7 = sshll.u32 (!%p204_p9), %s1031_s22, 2  ;;  %v892_v3 = vld [vmem:[%s1219_s3 + $0x8] sm:$0xff] (!%p204_p9)   ;;  %v895_v6 = vld [vmem:[%s1219_s3 + $0x10] sm:$0xff] (!%p204_p9)   ;;  %vm348_vm0 = vcmask (!%p204_p9), 523264   ;;  %s234_s16 = sand.u32 (!%p204_p9), 1, %s967_s19  }
   0xe   : > { %207 = sbr.rel (%p204_p9) target bundleno = 291 (0x123), region = 40  ;;  %v890_v1 = vld [vmem:[%s1218_s2 + $0x40] sm:$0xff] (!%p204_p9)   ;;  %p238_p10 = scmp.lt.s32.totalorder (!%p204_p9), %s736_s7, 15  ;;  %815 = vmatprep.subr.bf16.mxu0 (!%p204_p9), %v889_v0  ;;  %v893_v4 = vld [vmem:[%s1218_s2 + $0x48] sm:$0xff] (!%p204_p9)   ;;  %v896_v7 = vld [vmem:[%s1218_s2 + $0x50] sm:$0xff] (!%p204_p9)  }
   0xf   : > { %v891_v2 = vld [vmem:[%s1218_s2] sm:$0xff] (!%p204_p9)   ;;  %781 = vmatprep.subr.bf16.mxu1 (!%p204_p9), %v890_v1  ;;  %816 = vmatpush3.bf16.msra.mxu0 (!%p204_p9), %v889_v0  ;;  %v894_v5 = vld [vmem:[%s1218_s2 + $0x8] sm:$0xff] (!%p204_p9)   ;;  %v897_v8 = vld [vmem:[%s1218_s2 + $0x10] sm:$0xff] (!%p204_p9)   ;;  %s735_s17 = sshll.u32 (!%p204_p9), %s234_s16, 5  ;;  %s1175_s10 = scalar_lea.sflag (!%p204_p9), [#allocation3], %s234_s16 }
  0x10   : > { %782 = vmatpush3.bf16.msra.mxu1 (!%p204_p9), %v891_v2  ;;  %817 = vmatprep.subr.bf16.mxu0 (!%p204_p9), %v892_v3  ;;  %v898_v9 = vld [vmem:[%s1219_s3 + $0x18] sm:$0xff] (!%p204_p9)   ;;  %v901_v15 = vld [vmem:[%s1218_s2 + $0x60] sm:$0xff] (!%p204_p9)   ;;  %v904_v21 = vld [vmem:[%s1218_s2 + $0x68] sm:$0xff] (!%p204_p9)  }
  0x11   : > { %783 = vmatprep.subr.bf16.mxu1 (!%p204_p9), %v893_v4  ;;  %v899_v10 = vld [vmem:[%s1218_s2 + $0x58] sm:$0xff] (!%p204_p9)   ;;  %v902_v16 = vld [vmem:[%s1218_s2 + $0x80] sm:$0xff] (!%p204_p9)   ;;  %v905_v22 = vld [vmem:[%s1218_s2 + $0x88] sm:$0xff] (!%p204_p9)  }
  0x12   : > { %v900_v11 = vld [vmem:[%s1218_s2 + $0x18] sm:$0xff] (!%p204_p9)   ;;  %v903_v20 = vld [vmem:[%s1218_s2 + $0x20] sm:$0xff] (!%p204_p9)   ;;  %v906_v23 = vld [vmem:[%s1218_s2 + $0x28] sm:$0xff] (!%p204_p9)  }
  0x13   : > { %818 = vmatpush3.bf16.msra.mxu0 (!%p204_p9), %v892_v3  ;;  %v907_v24 = vld [vmem:[%s1218_s2 + $0x70] sm:$0xff] (!%p204_p9)   ;;  %v911_v27 = vld [vmem:[%s1218_s2 + $0x98] sm:$0xff] (!%p204_p9)   ;;  %v768_v56 = vld [vmem:[%s1220_s4] ss:$0 sm:$0xff] (!%p204_p9) }
  0x14   : > { %784 = vmatpush3.bf16.msra.mxu1 (!%p204_p9), %v894_v5  ;;  %819 = vmatprep.subr.bf16.mxu0 (!%p204_p9), %v895_v6  ;;  %v908_v25 = vld [vmem:[%s1218_s2 + $0x90] sm:$0xff] (!%p204_p9)   ;;  %v910_v28 = vld [vmem:[%s1218_s2 + $0x78] sm:$0xff] (!%p204_p9)  }
  0x15   : > { %s1229_s7 = smov (!%p238_p10, %s736_s7), 15  ;;  %785 = vmatprep.subr.bf16.mxu1 %v896_v7  ;;  %v909_v26 = vld [vmem:[%s1218_s2 + $0x30] sm:$0xff]   ;;  %v912_v37 = vld [vmem:[%s1218_s2 + $0x38] sm:$0xff]  }
  0x16   : > { %s739_s26 = sshll.u32 %s1229_s7, 3  ;;  %s847_s12 = smul.u32 24, %s1229_s7 }
  0x17   : > { %s248_s14 = scalar_lea.vmem %s1217_s1, %s739_s26  ;;  %820 = vmatpush3.bf16.msra.mxu0 %v895_v6  ;;  %s236_s7 = scalar_lea.vmem [#allocation2], %s735_s17 }
  0x18   : > { %786 = vmatpush3.bf16.msra.mxu1 %v897_v8  ;;  %821 = vmatprep.subr.bf16.mxu0 %v898_v9  ;;  %v310_v12 = vld [vmem:[%s248_s14] sm:$0xff]  ;;  %v311_v13 = vld [vmem:[%s248_s14 + $0x8] sm:$0xff]  ;;  %v312_v17 = vld [vmem:[%s248_s14 + $0x10] sm:$0xff]  ;;  %s1131_s6 = scalar_lea.vmem %s1216_s0, %s847_s12  ;;  %s657_s30 = sshll.u32 %s236_s7, 4  ;;  %s1166_s30 = int_to_ptr.vmem [resolvable:$true] %s657_s30 }
  0x19   : > { %787 = vmatprep.subr.bf16.mxu1 %v899_v10  ;;  %v314_v14 = vpack.c.bf16 %v311_v13, %v310_v12  ;;  %v313_v18 = vld [vmem:[%s248_s14 + $0x18] sm:$0xff]  ;;  %v253_v29 = vld [vmem:[%s1131_s6 + $0x8] sm:$0xff]  ;;  %v256_v30 = vld [vmem:[%s1131_s6 + $0x20] sm:$0xff]  ;;  %s774_s26 = sshll.u32 %s1031_s22, 9  ;;  %s913_s11 = scalar_lea.vmem %s1166_s30, 512 }
  0x1a   : > { %v315_v19 = vpack.c.bf16 %v313_v18, %v312_v17  ;;  %v265_v31 = vpack.c.bf16 %v256_v30, %v253_v29  ;;  %v254_v32 = vld [vmem:[%s1131_s6 + $0x10] sm:$0xff]  ;;  %v257_v33 = vld [vmem:[%s1131_s6 + $0x28] sm:$0xff]  ;;  %v260_v35 = vld [vmem:[%s1131_s6 + $0x40] sm:$0xff]  ;;  %s1171_s9 = scalar_lea.hbm %s1221_s5, %s774_s26  ;;  %p914_p11 = scmp.ne.s32.totalorder %s1166_s30, %s913_s11 }
  0x1b   : > { %822 = vmatpush3.bf16.msra.mxu0 %v898_v9  ;;  %823 = vmatprep.mubr.msk.bf16.mxu0 %vm348_vm0, %v314_v14  ;;  %v266_v34 = vpack.c.bf16 %v257_v33, %v254_v32  ;;  %v263_v36 = vld [vmem:[%s1131_s6 + $0x58] sm:$0xff]  ;;  %v252_v38 = vld [vmem:[%s1131_s6] sm:$0xff]  ;;  %v262_v41 = vld [vmem:[%s1131_s6 + $0x50] sm:$0xff]  ;;  %s977_s22 = smov [#allocation2]  }
  0x1c   : > { %788 = vmatpush3.bf16.msra.mxu1 %v900_v11  ;;  %827 = vmatprep.subr.bf16.mxu0 %v902_v16  ;;  %v255_v39 = vld [vmem:[%s1131_s6 + $0x18] sm:$0xff]  ;;  %v269_v42 = vpack.c.bf16 %v263_v36, %v260_v35  ;;  %v258_v45 = vld [vmem:[%s1131_s6 + $0x30] sm:$0xff]  ;;  %v261_v46 = vld [vmem:[%s1131_s6 + $0x48] sm:$0xff]  ;;  %p915_p12 = pnand %p914_p11, %p1048_p5  ;;  %s917_s12 = sshll.u32 %s977_s22, 4  ;;  %s918_s12 = int_to_ptr.vmem [resolvable:$false] %s917_s12 }
  0x1d   : > { %789 = vmatprep.subr.bf16.mxu1 %v901_v15  ;;  %562 = vmatprep.mubr.bf16.mxu1 %v265_v31  ;;  %v259_v40 = vld [vmem:[%s1131_s6 + $0x38] sm:$0xff]  ;;  %v264_v43 = vpack.c.bf16 %v255_v39, %v252_v38  ;;  %v267_v47 = vpack.c.bf16 %v261_v46, %v258_v45  ;;  %s919_s13 = scalar_lea.vmem %s918_s12, 1024  ;;  %p920_p0 = scmp.lt.s32.totalorder %s1166_s30, %s918_s12 }
  0x1e   : > { %824 = vmatmul.mubr.msk.bf16.vlgmr.msra.gmra.mrb[0].mxu0 %vm348_vm0, %v315_v19  ;;  %v268_v44 = vpack.c.bf16 %v262_v41, %v259_v40  ;;  %p916_p13 = pneg %p915_p12  ;;  %p921_p1 = scmp.lt.s32.totalorder %s919_s13, %s913_s11 }
  0x1f   : > { %828 = vmatpush3.bf16.msra.mxu0 %v902_v16  ;;  %835 = vmatprep.mubr.msk.bf16.mxu0 %vm348_vm0, %v266_v34 }
  0x20   : > { %790 = vmatpush3.bf16.msra.mxu1 %v903_v20  ;;  %829 = vmatprep.subr.bf16.mxu0 %v905_v22  ;;  %p922_p2 = por %p921_p1, %p920_p0 }
  0x21   : > { %791 = vmatprep.subr.bf16.mxu1 %v904_v21 }
  0x22   : > { %p923_p3 = pnand %p922_p2, %p916_p13 }
  0x23   : > { %830 = vmatpush3.bf16.msra.mxu0 %v905_v22 }
  0x24   : > { %792 = vmatpush3.bf16.msra.mxu1 %v906_v23  ;;  %831 = vmatprep.subr.bf16.mxu0 %v908_v25 }
  0x25   : > { %793 = vmatprep.subr.bf16.mxu1 %v907_v24 }
  0x27   : > { %832 = vmatpush3.bf16.msra.mxu0 %v908_v25 }
  0x28   : > { %794 = vmatpush3.bf16.msra.mxu1 %v909_v26  ;;  %833 = vmatprep.subr.bf16.mxu0 %v911_v27 }
  0x29   : > { %795 = vmatprep.subr.bf16.mxu1 %v910_v28 }
  0x2b   : > { %834 = vmatpush3.bf16.msra.mxu0 %v911_v27 }
  0x2c   : > { %796 = vmatpush3.bf16.msra.mxu1 %v912_v37 }
  0x2e   : > { %836 = vmatmul.mubr.msk.bf16.vlgmr.msra.gmra.mrb[0].mxu0 %vm348_vm0, %v269_v42 }
  0x2f   : > { %563 = vmatmul.mubr.bf16.vlgmr.msra.gmra.mrb[0].mxu1 %v264_v43 }
  0x30   : > { %570 = vmatprep.mubr.bf16.mxu1 %v268_v44 }
  0x37   : > { %571 = vmatmul.mubr.bf16.gmra.mrb[4].mxu1 %v267_v47 }
 0x101   : > { %v837_v48 = vpop.f32.mrb[0].mxu0 }
 0x102   : > { %v797_v49 = vpop.f32.mrb[0].mxu1  ;;  %v613_v50 = vpop.f32.mrb[1].mxu0 }
 0x103   : > { %v798_v51 = vpop.f32.mrb[1].mxu1  ;;  %v838_v52 = vpop.f32.mrb[2].mxu0 }
 0x104   : > { %v799_v53 = vadd.f32 %v798_v51, %v797_v49  ;;  %v800_v54 = vpop.f32.mrb[2].mxu1  ;;  %v616_v55 = vpop.f32.mrb[3].mxu0 }
 0x105   : > { %v801_v57 = vpop.f32.mrb[3].mxu1 }
 0x106   : > { %v840_v58 = vadd.f32 %v799_v53, %v613_v50  ;;  %v802_v59 = vadd.f32 %v801_v57, %v800_v54 }
 0x108   : > { %v635_v60 = vadd.f32 %v840_v58, %v768_v56  ;;  %v842_v61 = vadd.f32 %v802_v59, %v616_v55 }
 0x10a   : > { %639 = vst [vmem:[%s236_s7] sm:$0xff] %v635_v60  ;;  %v636_v62 = vadd.f32 %v842_v61, %v768_v56  ;;  %v803_v63 = vpop.f32.mrb[4].mxu1 }
 0x10b   : > { %v804_v0 = vpop.f32.mrb[5].mxu1 }
 0x10c   : > { %640 = vst [vmem:[%s236_s7 + $0x8] sm:$0xff] %v636_v62  ;;  %v805_v1 = vadd.f32 %v804_v0, %v803_v63  ;;  %v806_v2 = vpop.f32.mrb[6].mxu1 }
 0x10d   : > { %v807_v3 = vpop.f32.mrb[7].mxu1 }
 0x10e   : > { %v839_v4 = vadd.f32 %v837_v48, %v805_v1  ;;  %v808_v5 = vadd.f32 %v807_v3, %v806_v2 }
 0x110   : > { %v637_v6 = vadd.f32 %v839_v4, %v768_v56  ;;  %v841_v7 = vadd.f32 %v838_v52, %v808_v5 }
 0x112   : > { %641 = vst [vmem:[%s236_s7 + $0x10] sm:$0xff] %v637_v6  ;;  %v638_v8 = vadd.f32 %v841_v7, %v768_v56 }
 0x114   : > { %642 = vst [vmem:[%s236_s7 + $0x18] sm:$0xff] %v638_v8 }
 0x115   : > { %926 = shalt.err (!%p923_p3)
}
 0x116   : > { %s927_s15 = scalar_lea.hbm %s1171_s9, 512  ;;  %s931_s17 = scalar_lea.hbm %s1221_s5, 2048 }
 0x117   : > { %p928_p4 = scmp.ne.s32.totalorder %s1171_s9, %s927_s15  ;;  %p932_p9 = scmp.lt.u32.totalorder %s1171_s9, %s1221_s5 }
 0x118   : > { %p933_p10 = scmp.lt.u32.totalorder %s931_s17, %s927_s15  ;;  %p935_p12 = scmp.lt.u32.totalorder %s927_s15, %s1171_s9 }
 0x119   : > { %p929_p7 = pnand %p928_p4, %p1048_p5 }
 0x11a   : > { %p934_p11 = por %p933_p10, %p932_p9 }
 0x11b   : > { %p930_p8 = pneg %p929_p7 }
 0x11c   : > { %p936_p13 = por %p935_p12, %p934_p11 }
 0x11e   : > { %p937_p0 = pnand %p936_p13, %p930_p8 }
 0x120   : > { %940 = shalt.err (!%p937_p0)
}
 0x121   : > { %s978_s7 = smov 128   ;;  %s979_s26 = smov 8  }
 0x122   : > { %848 = dma.vmem_to_hbm [thread:$0]  (%p1048_p5), %s1166_s30, 512, %s1171_s9, %s1175_s10, %s978_s7, %s978_s7, %s979_s26  }
 0x123 PF: > { %p854_p1 = scmp.ge.s32.totalorder %s975_s21, 2  ;;  %s672_s6 = sand.u32 1, %s963_s18  }
 0x124   : > { %s673_s8 = scalar_lea.sflag [#allocation3], %s672_s6 }
 0x125   : > { %p851_p2 = pnand %p854_p1, %p1052_p6 }
 0x127   : > { %958 = dma.done.wait (!%p851_p2), %s673_s8, 512  }
 0x128   : > { %960 = vsyncadd (!%p851_p2), %s673_s8, 4294966784  ;;  %p15_p3 = scmp.ge.s32.totalorder %s1035_s24, 6   ;;  %s1224_s18 = smov %s967_s19 }
 0x129   : > { %s1225_s19 = smov %s971_s20  ;;  %s1226_s20 = smov %s1046_s27 }
 0x12a   : > { %s1227_s21 = smov %s1035_s24  ;;  %17 = sbr.rel (!%p15_p3) target bundleno = 3 (0x3), region = 78 }
 0x131   :  { %678 = vsyncpa [#allocation3], 1 }
 0x132   :  { %680 = vsyncpa [#allocation3 + $0x1], 1 }

</bundles_post_ra>
